<compile_context>
chip_gen: v7x
topology: tpu7x:2x2x1
jax: 0.10.0
libtpu: 0.0.40
codegen_flags: <defaults>
</compile_context>

<pallas_src>
import math

import jax
import jax.numpy as jnp
from jax.experimental import pallas as pl
from jax.experimental.pallas import tpu as pltpu


_VMEM_BUDGET_BYTES = 20 * 1024 * 1024   # tile-selection budget
_VMEM_LIMIT_BYTES = 32 * 1024 * 1024    # scoped limit handed to Mosaic
_MAX_EDGE_TILE = 2048                   # mem-bound returns flatten past ~1-2K rows
_MAX_FUSED_NODES = 1024                 # one-hot MXU gather beats streaming below this
                                        # on all of v5e/v6e/v7x (raise to ~4K on v6e/v7x)


def _round_up(x, m):
    return ((x + m - 1) // m) * m


# ---------------------------------------------------------------------------
# Kernels
# ---------------------------------------------------------------------------
def _distmult_fused_kernel(src_ref, tgt_ref, typ_ref, xt_ref, rt_ref, o_ref):
    """Fully fused DistMult scoring for one edge tile.

    src_ref/tgt_ref/typ_ref: (1, 1, TE) int32 edge indices (lane-dense tiles).
    xt_ref: (D, num_nodes) f32 node table, transposed, resident in VMEM.
    rt_ref: (D, num_rel)   f32 relation table, transposed, resident in VMEM.
    o_ref:  (1, 1, TE) f32 per-edge scores (lane-dense).
    """
    num_nodes = xt_ref.shape[1]
    num_rel = rt_ref.shape[1]
    te = src_ref.shape[-1]

    src_idx = src_ref[...].reshape(1, te)
    tgt_idx = tgt_ref[...].reshape(1, te)
    typ_idx = typ_ref[...].reshape(1, te)

    node_iota = jax.lax.broadcasted_iota(jnp.int32, (num_nodes, te), 0)
    rel_iota = jax.lax.broadcasted_iota(jnp.int32, (num_rel, te), 0)

    xt = xt_ref[...]
    rt = rt_ref[...]
    # One-hot row selection -> matmul gather on the (otherwise idle) MXU.
    oh_src = (node_iota == src_idx).astype(xt.dtype)   # (num_nodes, TE)
    oh_tgt = (node_iota == tgt_idx).astype(xt.dtype)   # (num_nodes, TE)
    oh_rel = (rel_iota == typ_idx).astype(rt.dtype)    # (num_rel,  TE)

    hi = jax.lax.Precision.HIGHEST
    src_t = jnp.dot(xt, oh_src, precision=hi, preferred_element_type=jnp.float32)  # (D, TE)
    tgt_t = jnp.dot(xt, oh_tgt, precision=hi, preferred_element_type=jnp.float32)  # (D, TE)
    rel_t = jnp.dot(rt, oh_rel, precision=hi, preferred_element_type=jnp.float32)  # (D, TE)

    # Elementwise product on the VPU, reduce over D (sublanes) -> lane-dense row.
    scores = jnp.sum(src_t * rel_t * tgt_t, axis=0, keepdims=True)   # (1, TE)
    o_ref[...] = scores.reshape(1, 1, te)


def _distmult_stream_kernel(typ_ref, s_ref, t_ref, r_ref, o_ref):
    """Streaming fallback: src/tgt rows pre-gathered by XLA, relation gather fused.

    typ_ref: (TE, 1) int32; s_ref / t_ref: (TE, D) f32;
    r_ref:   (num_rel, D) f32 (resident); o_ref: (TE, 1) f32.
    """
    te = s_ref.shape[0]
    num_rel = r_ref.shape[0]

    rel_iota = jax.lax.broadcasted_iota(jnp.int32, (te, num_rel), 1)
    oh_rel = (rel_iota == typ_ref[...]).astype(r_ref.dtype)          # (TE, num_rel)
    rel = jnp.dot(oh_rel, r_ref[...], precision=jax.lax.Precision.HIGHEST,
                  preferred_element_type=jnp.float32)                # (TE, D)

    prod = s_ref[...].astype(jnp.float32) * rel * t_ref[...].astype(jnp.float32)
    o_ref[...] = jnp.sum(prod, axis=-1, keepdims=True)


# ---------------------------------------------------------------------------
# VMEM budgeting / tile choice
# ---------------------------------------------------------------------------
def _fused_resident_bytes(d, num_nodes, num_rel):
    # Full-block resident tables are still double-buffered by the pipeline.
    return 2 * _round_up(d, 8) * (_round_up(num_nodes, 128) + _round_up(num_rel, 128)) * 4


def _choose_fused_tile(num_edges, d, num_nodes, num_rel):
    resident = _fused_resident_bytes(d, num_nodes, num_rel)
    per_edge = 4 * (
        4 * 2 * 8                              # 3 idx inputs + 1 output: (1,1,TE) tiles,
                                               #   8-sublane padded, double-buffered
        + 2 * _round_up(num_nodes, 8)          # src/tgt one-hot intermediates
        + _round_up(num_rel, 8)                # rel one-hot intermediate
        + 4 * _round_up(d, 8))                 # src_t / tgt_t / rel_t / prod
    te = max(0, _VMEM_BUDGET_BYTES - resident) // per_edge
    te = max(128, min(_MAX_EDGE_TILE, (te // 128) * 128))
    return min(te, _round_up(max(num_edges, 1), 128))


def _choose_stream_tile(num_edges, d, num_rel):
    pad_d = _round_up(d, 128)
    resident = 2 * _round_up(num_rel, 8) * pad_d * 4          # resident R (double-buffered)
    per_edge = 4 * (
        2 * 2 * pad_d                          # src/tgt input tiles, double-buffered
        + 2 * pad_d                            # rel + prod intermediates
        + 2 * 128                              # (TE,1) edge-type tile, lane-padded, 2 bufs
        + 2 * 128)                             # (TE,1) output tile, lane-padded, 2 bufs
    te = max(0, _VMEM_BUDGET_BYTES - resident) // per_edge
    te = max(128, min(_MAX_EDGE_TILE, (te // 128) * 128))
    return min(te, _round_up(max(num_edges, 1), 128))


def _use_fused_path(num_nodes, num_rel, d):
    if num_nodes > _MAX_FUSED_NODES:
        return False
    return _fused_resident_bytes(d, num_nodes, num_rel) <= _VMEM_BUDGET_BYTES // 2


# ---------------------------------------------------------------------------
# pallas_call wrappers
# ---------------------------------------------------------------------------
def distmult_scores_fused(x_t, r_t, src_idx, tgt_idx, etype, *, edge_tile=None):
    """Fully fused path: in-kernel gathers against VMEM-resident X^T / R^T."""
    d, num_nodes = x_t.shape
    num_rel = r_t.shape[1]
    num_edges = src_idx.shape[0]

    te = edge_tile if edge_tile is not None else _choose_fused_tile(
        num_edges, d, num_nodes, num_rel)
    nb = pl.cdiv(num_edges, te)
    e_pad = nb * te

    def as_tiles(idx):
        # Pad with index 0 (always valid); padded tail scores are sliced off.
        idx = jnp.pad(idx.astype(jnp.int32), (0, e_pad - num_edges))
        return idx.reshape(nb, 1, te)

    src2, tgt2, typ2 = as_tiles(src_idx), as_tiles(tgt_idx), as_tiles(etype)

    idx_spec = pl.BlockSpec((1, 1, te), lambda i: (i, 0, 0))
    out = pl.pallas_call(
        _distmult_fused_kernel,
        out_shape=jax.ShapeDtypeStruct((nb, 1, te), jnp.float32),
        grid=(nb,),
        in_specs=[idx_spec, idx_spec, idx_spec,
                  pl.BlockSpec((d, num_nodes), lambda i: (0, 0)),   # resident node table
                  pl.BlockSpec((d, num_rel), lambda i: (0, 0))],    # resident relation table
        out_specs=pl.BlockSpec((1, 1, te), lambda i: (i, 0, 0)),    # lane-dense scores
        compiler_params=pltpu.CompilerParams(
            dimension_semantics=("parallel",),                       # megacore on v7x
            vmem_limit_bytes=_VMEM_LIMIT_BYTES,
        ),
    )(src2, tgt2, typ2, x_t, r_t)
    return out.reshape(e_pad)[:num_edges]


def distmult_scores_streamed(src_e, tgt_e, etype, r, *, edge_tile=None):
    """Fallback path: XLA-gathered (E, D) src/tgt streams, relation gather fused."""
    num_edges, d = src_e.shape
    num_rel = r.shape[0]
    te = edge_tile if edge_tile is not None else _choose_stream_tile(num_edges, d, num_rel)
    grid = (pl.cdiv(num_edges, te),)    # partial final block: masked output store

    emb_spec = pl.BlockSpec((te, d), lambda i: (i, 0))
    out = pl.pallas_call(
        _distmult_stream_kernel,
        out_shape=jax.ShapeDtypeStruct((num_edges, 1), jnp.float32),
        grid=grid,
        in_specs=[pl.BlockSpec((te, 1), lambda i: (i, 0)),
                  emb_spec, emb_spec,
                  pl.BlockSpec((num_rel, d), lambda i: (0, 0))],    # resident relation table
        out_specs=pl.BlockSpec((te, 1), lambda i: (i, 0)),
        compiler_params=pltpu.CompilerParams(
            dimension_semantics=("parallel",),
            vmem_limit_bytes=_VMEM_LIMIT_BYTES,
        ),
    )(etype.astype(jnp.int32).reshape(num_edges, 1), src_e, tgt_e, r)
    return out[:, 0]


@jax.jit
def _distmult_forward(R, X_feat, edge_list, edge_type):
    num_rel, d = R.shape
    num_nodes = X_feat.shape[0]
    src_idx = edge_list[0, :].astype(jnp.int32)
    tgt_idx = edge_list[1, :].astype(jnp.int32)
    etype = edge_type[0, :].astype(jnp.int32)

    if _use_fused_path(num_nodes, num_rel, d):
        # Node + relation tables fit comfortably in VMEM: fuse all gathers.
        return distmult_scores_fused(X_feat.T, R.T, src_idx, tgt_idx, etype)

    # Node table too large for the resident one-hot gather: XLA row gathers
    # for src/tgt, relation gather still fused into the kernel.
    src = jnp.take(X_feat, src_idx, axis=0)
    tgt = jnp.take(X_feat, tgt_idx, axis=0)
    return distmult_scores_streamed(src, tgt, etype, R)


class DistMultLayer:
    """JAX equivalent of the PyTorch DistMult_Layer."""

    def __init__(self, xdim, num_rel, key):
        # nn.init.xavier_uniform_ on a (num_rel, xdim) parameter.
        bound = math.sqrt(6.0 / (num_rel + xdim))
        self.R = jax.random.uniform(
            key, (num_rel, xdim), jnp.float32, minval=-bound, maxval=bound)

    def __call__(self, X_feat, edge_list, edge_type):
        return _distmult_forward(self.R, X_feat, edge_list, edge_type)


if __name__ == "__main__":
    key = jax.random.PRNGKey(0)
    k_r, k_x, k_src, k_tgt, k_type = jax.random.split(key, 5)

    num_nodes = 64      # num_nodes
    xdim = 32           # node embedding dim
    num_rel = 4         # number of relations
    num_edges = 256     # |E|

    X_feat = jax.random.normal(k_x, (num_nodes, xdim), jnp.float32)
    edge_list = jnp.stack([
        jax.random.randint(k_src, (num_edges,), 0, num_nodes, dtype=jnp.int32),
        jax.random.randint(k_tgt, (num_edges,), 0, num_nodes, dtype=jnp.int32),
    ], axis=0)                                                 # (2, |E|)
    edge_type = jax.random.randint(
        k_type, (1, num_edges), 0, num_rel, dtype=jnp.int32)   # (1, |E|)

    layer = DistMultLayer(xdim, num_rel, k_r)

    # Primary (fully fused) path.
    scores = jax.block_until_ready(layer(X_feat, edge_list, edge_type))

    # Pure-JAX reference for correctness.
    ref = jnp.sum(
        jnp.take(X_feat, edge_list[0], axis=0)
        * jnp.take(layer.R, edge_type[0], axis=0)
        * jnp.take(X_feat, edge_list[1], axis=0),
        axis=1,
    )
    assert scores.shape == (num_edges,)
    assert jnp.allclose(scores, ref, atol=1e-5, rtol=1e-5)

    # Also exercise the streaming fallback kernel (used when X_feat is too big
    # for the VMEM-resident one-hot gather path).
    src_e = jnp.take(X_feat, edge_list[0], axis=0)
    tgt_e = jnp.take(X_feat, edge_list[1], axis=0)
    scores_fb = jax.block_until_ready(
        distmult_scores_streamed(src_e, tgt_e, edge_type[0], layer.R))
    assert jnp.allclose(scores_fb, ref, atol=1e-5, rtol=1e-5)

    print("KERNEL_OK")
</pallas_src>

<mosaic_0001>
module attributes {stable_mosaic.version = 11 : i64} {
  func.func @_distmult_fused_kernel(%arg0: i32, %arg1: memref<1x1x256xi32, #tpu.memory_space<vmem>>, %arg2: memref<1x1x256xi32, #tpu.memory_space<vmem>>, %arg3: memref<1x1x256xi32, #tpu.memory_space<vmem>>, %arg4: memref<32x64xf32, #tpu.memory_space<vmem>>, %arg5: memref<32x4xf32, #tpu.memory_space<vmem>>, %arg6: memref<1x1x256xf32, #tpu.memory_space<vmem>>) attributes {dimension_semantics = [#tpu.dimension_semantics<parallel>], iteration_bounds = array<i64: 1>, scalar_prefetch = 0 : i64, scratch_operands = 0 : i64, tpu.core_type = #tpu.core_type<tc>, window_params = [{transform_indices = @transform_0, window_bounds = array<i64: 1, 1, 256>}, {transform_indices = @transform_1, window_bounds = array<i64: 1, 1, 256>}, {transform_indices = @transform_2, window_bounds = array<i64: 1, 1, 256>}, {pipeline_mode = #tpu.pipeline_mode<synchronous>, transform_indices = @transform_3, window_bounds = array<i64: 32, 64>}, {pipeline_mode = #tpu.pipeline_mode<synchronous>, transform_indices = @transform_4, window_bounds = array<i64: 32, 4>}, {transform_indices = @transform_5, window_bounds = array<i64: 1, 1, 256>}]} {
    %c0 = arith.constant 0 : index
    %c0_0 = arith.constant 0 : index
    %c0_1 = arith.constant 0 : index
    %0 = vector.load %arg1[%c0, %c0_0, %c0_1] : memref<1x1x256xi32, #tpu.memory_space<vmem>>, vector<1x1x256xi32>
    %1 = vector.shape_cast %0 : vector<1x1x256xi32> to vector<1x256xi32>
    %c0_2 = arith.constant 0 : index
    %c0_3 = arith.constant 0 : index
    %c0_4 = arith.constant 0 : index
    %2 = vector.load %arg2[%c0_2, %c0_3, %c0_4] : memref<1x1x256xi32, #tpu.memory_space<vmem>>, vector<1x1x256xi32>
    %3 = vector.shape_cast %2 : vector<1x1x256xi32> to vector<1x256xi32>
    %c0_5 = arith.constant 0 : index
    %c0_6 = arith.constant 0 : index
    %c0_7 = arith.constant 0 : index
    %4 = vector.load %arg3[%c0_5, %c0_6, %c0_7] : memref<1x1x256xi32, #tpu.memory_space<vmem>>, vector<1x1x256xi32>
    %5 = vector.shape_cast %4 : vector<1x1x256xi32> to vector<1x256xi32>
    %6 = tpu.iota {dimensions = array<i32: 0>} : vector<64x256xi32>
    %7 = tpu.iota {dimensions = array<i32: 0>} : vector<4x256xi32>
    %c0_8 = arith.constant 0 : index
    %c0_9 = arith.constant 0 : index
    %8 = vector.load %arg4[%c0_8, %c0_9] : memref<32x64xf32, #tpu.memory_space<vmem>>, vector<32x64xf32>
    %c0_10 = arith.constant 0 : index
    %c0_11 = arith.constant 0 : index
    %9 = vector.load %arg5[%c0_10, %c0_11] : memref<32x4xf32, #tpu.memory_space<vmem>>, vector<32x4xf32>
    %10 = vector.broadcast %1 : vector<1x256xi32> to vector<64x256xi32>
    %11 = arith.cmpi eq, %6, %10 : vector<64x256xi32>
    %12 = arith.extui %11 : vector<64x256xi1> to vector<64x256xi32>
    %13 = arith.sitofp %12 : vector<64x256xi32> to vector<64x256xf32>
    %14 = vector.broadcast %3 : vector<1x256xi32> to vector<64x256xi32>
    %15 = arith.cmpi eq, %6, %14 : vector<64x256xi32>
    %16 = arith.extui %15 : vector<64x256xi1> to vector<64x256xi32>
    %17 = arith.sitofp %16 : vector<64x256xi32> to vector<64x256xf32>
    %18 = vector.broadcast %5 : vector<1x256xi32> to vector<4x256xi32>
    %19 = arith.cmpi eq, %7, %18 : vector<4x256xi32>
    %20 = arith.extui %19 : vector<4x256xi1> to vector<4x256xi32>
    %21 = arith.sitofp %20 : vector<4x256xi32> to vector<4x256xf32>
    %cst = arith.constant dense<0.000000e+00> : vector<32x256xf32>
    %22 = tpu.matmul %8, %13, %cst {dimension_numbers = #tpu.dot_dimension_numbers<[1], [0], [0], [1], [0, 0, 1, 1], [], []>, precision = #tpu.contract_precision<fp32>} : vector<32x64xf32>, vector<64x256xf32>, vector<32x256xf32> -> vector<32x256xf32>
    %cst_12 = arith.constant dense<0.000000e+00> : vector<32x256xf32>
    %23 = tpu.matmul %8, %17, %cst_12 {dimension_numbers = #tpu.dot_dimension_numbers<[1], [0], [0], [1], [0, 0, 1, 1], [], []>, precision = #tpu.contract_precision<fp32>} : vector<32x64xf32>, vector<64x256xf32>, vector<32x256xf32> -> vector<32x256xf32>
    %cst_13 = arith.constant dense<0.000000e+00> : vector<32x256xf32>
    %24 = tpu.matmul %9, %21, %cst_13 {dimension_numbers = #tpu.dot_dimension_numbers<[1], [0], [0], [1], [0, 0, 1, 1], [], []>, precision = #tpu.contract_precision<fp32>} : vector<32x4xf32>, vector<4x256xf32>, vector<32x256xf32> -> vector<32x256xf32>
    %25 = arith.mulf %22, %24 : vector<32x256xf32>
    %26 = arith.mulf %25, %23 : vector<32x256xf32>
    %cst_14 = arith.constant dense<0.000000e+00> : vector<256xf32>
    %27 = vector.multi_reduction <add>, %26, %cst_14 [0] : vector<32x256xf32> to vector<256xf32>
    %28 = vector.shape_cast %27 : vector<256xf32> to vector<1x256xf32>
    %29 = vector.shape_cast %28 : vector<1x256xf32> to vector<1x1x256xf32>
    %c0_15 = arith.constant 0 : index
    %c0_16 = arith.constant 0 : index
    %c0_17 = arith.constant 0 : index
    %30 = vector.load %arg6[%c0_15, %c0_16, %c0_17] : memref<1x1x256xf32, #tpu.memory_space<vmem>>, vector<1x1x256xf32>
    tpu.vector_store %arg6[%c0_15, %c0_16, %c0_17], %29 {strides = array<i32>} : memref<1x1x256xf32, #tpu.memory_space<vmem>>, vector<1x1x256xf32>,
    return
  }
  func.func @transform_0(%arg0: i32) -> (i32, i32, i32) {
    %c0_i32 = arith.constant 0 : i32
    %c0_i32_0 = arith.constant 0 : i32
    %c0_i32_1 = arith.constant 0 : i32
    return %arg0, %c0_i32, %c0_i32_0 : i32, i32, i32
  }
  func.func @transform_1(%arg0: i32) -> (i32, i32, i32) {
    %c0_i32 = arith.constant 0 : i32
    %c0_i32_0 = arith.constant 0 : i32
    %c0_i32_1 = arith.constant 0 : i32
    return %arg0, %c0_i32, %c0_i32_0 : i32, i32, i32
  }
  func.func @transform_2(%arg0: i32) -> (i32, i32, i32) {
    %c0_i32 = arith.constant 0 : i32
    %c0_i32_0 = arith.constant 0 : i32
    %c0_i32_1 = arith.constant 0 : i32
    return %arg0, %c0_i32, %c0_i32_0 : i32, i32, i32
  }
  func.func @transform_3(%arg0: i32) -> (i32, i32) {
    %c0_i32 = arith.constant 0 : i32
    %c0_i32_0 = arith.constant 0 : i32
    %c0_i32_1 = arith.constant 0 : i32
    return %c0_i32, %c0_i32_0 : i32, i32
  }
  func.func @transform_4(%arg0: i32) -> (i32, i32) {
    %c0_i32 = arith.constant 0 : i32
    %c0_i32_0 = arith.constant 0 : i32
    %c0_i32_1 = arith.constant 0 : i32
    return %c0_i32, %c0_i32_0 : i32, i32
  }
  func.func @transform_5(%arg0: i32) -> (i32, i32, i32) {
    %c0_i32 = arith.constant 0 : i32
    %c0_i32_0 = arith.constant 0 : i32
    %c0_i32_1 = arith.constant 0 : i32
    return %arg0, %c0_i32, %c0_i32_0 : i32, i32, i32
  }
}

</mosaic_0001>

<bundles_post_ra>
// kernel: _distmult_forward.1
= control target key start
LH: loop header
LB: loop body
LE: loop exit
PB: predicated region body
PF: predicated region fallthrough
CT: control target
= control target key end

     0   :  { %v4022_v0 = vlaneseq  ;;  %v4025_v2 = vmov 0.0   ;;  %vm167_vm0 = vcmask 523264   ;;  %s4016_s0 = inlined_call_operand.vmem [shape: s32[1,1,256], index: 0, kind: input, shape index: {}]   ;;  %s4017_s1 = inlined_call_operand.vmem [shape: s32[1,1,256], index: 1, kind: input, shape index: {}]   ;;  %s4018_s2 = inlined_call_operand.vmem [shape: s32[1,1,256], index: 2, kind: input, shape index: {}]   ;;  %s4019_s3 = inlined_call_operand.vmem [shape: f32[32,64], index: 3, kind: input, shape index: {}]   ;;  %s4020_s4 = inlined_call_operand.vmem [shape: f32[32,4], index: 4, kind: input, shape index: {}]   ;;  %s4021_s5 = inlined_call_operand.hbm [shape: f32[1,1,256], index: 5, kind: output, shape index: {}]  }
   0x1   :  { %v33_v1 = vld [vmem:[%s4019_s3] sm:$0xff]  ;;  %260 = vmatprep.mubr.f32.mxu1 %v4025_v2  ;;  %687 = vmatprep.mubr.f32.mxu0 %v4025_v2  ;;  %v34_v3 = vld [vmem:[%s4019_s3 + $0x8] sm:$0xff]  ;;  %v35_v4 = vld [vmem:[%s4019_s3 + $0x10] sm:$0xff] }
   0x2   :  { %v36_v5 = vld [vmem:[%s4019_s3 + $0x18] sm:$0xff]  ;;  %v21_v6 = vld [vmem:[%s4016_s0] sm:$0x3]  ;;  %v2999_v7 = vshrl.u32 %v4022_v0, 7  ;;  %v169_v8 = vsel %vm167_vm0, %v33_v1, 0  ;;  %v172_v9 = vsel %vm167_vm0, %v34_v3, 0 }
   0x3   :  { %v175_v10 = vsel %vm167_vm0, %v35_v4, 0  ;;  %v3001_v11 = vand.u32 4294901760, %v169_v8  ;;  %v3003_v12 = vand.u32 4294901760, %v172_v9  ;;  %v3016_v17 = vsel %vm167_vm0, %v36_v5, 0 }
   0x4   :  { %4059 = vst [vmem:[#allocation5_spill] sm:$0xff] %v2999_v7  ;;  %v3005_v13 = vand.u32 4294901760, %v175_v10  ;;  %v3008_v14 = vadd.s32 8, %v2999_v7  ;;  %v3011_v15 = vsub.s32 1, %v2999_v7  ;;  %v3014_v16 = vsub.s32 0, %v2999_v7 }
   0x5   :  { %v3019_v18 = vadd.s32 16, %v2999_v7  ;;  %v3022_v19 = vadd.s32 24, %v2999_v7  ;;  %v3025_v20 = vadd.s32 32, %v2999_v7  ;;  %v3028_v21 = vadd.s32 40, %v2999_v7 }
   0x6   :  { %v3031_v22 = vrot.slane %v21_v6, %v3011_v15  ;;  %v3034_v23 = vrot.slane %v21_v6, %v3014_v16  ;;  %v3037_v24 = vadd.s32 48, %v2999_v7  ;;  %v3040_v25 = vsub.f32 %v169_v8, %v3001_v11 }
   0x8   :  { %4060 = vst [vmem:[#allocation6_spill] sm:$0xff] %v3040_v25 }
   0x9   :  { %10 = vsyncpa [#allocation3], 0  ;;  %v3043_v26 = vadd.s32 56, %v2999_v7  ;;  %v3046_v27 = vsub.f32 %v172_v9, %v3003_v12  ;;  %v3049_v28 = vsub.f32 %v175_v10, %v3005_v13  ;;  %v3052_v29 = vand.u32 4294901760, %v3016_v17 }
   0xa   :  { %vm50_vm1 = vcmp.eq.s32.totalorder %v2999_v7, %v3031_v22  ;;  %vm52_vm2 = vcmp.eq.s32.totalorder %v3008_v14, %v3031_v22  ;;  %vm49_vm3 = vcmp.eq.s32.totalorder %v2999_v7, %v3034_v23  ;;  %vm51_vm4 = vcmp.eq.s32.totalorder %v3008_v14, %v3034_v23 }
   0xb   :  { %4061 = vst [vmem:[#allocation7_spill] sm:$0xff] %v3043_v26  ;;  %4062 = vst [vmem:[#allocation8_spill] sm:$0xff] %v3046_v27  ;;  %v2472_v30 = vsel %vm50_vm1, 1.0, %v4025_v2  ;;  %v2474_v31 = vsel %vm52_vm2, 1.0, %v4025_v2  ;;  %v2471_v33 = vsel %vm49_vm3, 1.0, %v4025_v2  ;;  %v2473_v34 = vsel %vm51_vm4, 1.0, %v4025_v2 }
   0xc   :  { %4063 = vst [vmem:[#allocation9_spill] sm:$0xff] %v3049_v28  ;;  %vm3064_vm5 = vmpackc.low %vm52_vm2, %vm50_vm1  ;;  %v4023_v35 = vmov 1.0|1.0   ;;  %v3073_v36 = vsub.f32 %v2472_v30, %v2472_v30  ;;  %v3075_v37 = vsub.f32 %v2474_v31, %v2474_v31  ;;  %v3084_v39 = vsub.f32 %v2471_v33, %v2471_v33 }
   0xd   :  { %2608 = vmatprep.subr.msk.bf16.mxu1 %vm3064_vm5, %v4023_v35  ;;  %2656 = vmatprep.subr.msk.bf16.mxu0 %vm3064_vm5, %v4023_v35  ;;  %vm3080_vm6 = vmpackc.low %vm51_vm4, %vm49_vm3  ;;  %v3087_v40 = vand.u32 4294901760, %v3040_v25  ;;  %v3092_v41 = vsub.f32 %v2473_v34, %v2473_v34  ;;  %vm54_vm7 = vcmp.eq.s32.totalorder %v3019_v18, %v3031_v22  ;;  %vm56_vm8 = vcmp.eq.s32.totalorder %v3022_v19, %v3031_v22 }
   0xe   :  { %2610 = vmatpush1.bf16.msk.msra.mxu1 %vm3080_vm6, %v4023_v35  ;;  %2658 = vmatpush1.bf16.msk.msra.mxu0 %vm3080_vm6, %v4023_v35  ;;  %v3102_v42 = vand.u32 4294901760, %v3046_v27  ;;  %v313_v43 = vand.u32 4294901760, %v3084_v39  ;;  %v2476_v44 = vsel %vm54_vm7, 1.0, %v4025_v2  ;;  %v2478_v45 = vsel %vm56_vm8, 1.0, %v4025_v2  ;;  %vm3107_vm9 = vmpackc.low %vm56_vm8, %vm54_vm7 }
   0xf   :  { %4068 = vst [vmem:[#allocation10_spill] sm:$0xff] %v3087_v40  ;;  %vm53_vm10 = vcmp.eq.s32.totalorder %v3019_v18, %v3034_v23  ;;  %v325_v47 = vand.u32 4294901760, %v3092_v41  ;;  %2612 = vmatprep.subr.msk.bf16.mxu1 %vm3107_vm9, %v4023_v35  ;;  %v3117_v48 = vsub.f32 %v2476_v44, %v2476_v44  ;;  %v3119_v49 = vsub.f32 %v2478_v45, %v2478_v45 }
  0x10   :  { %4069 = vst [vmem:[#allocation11_spill] sm:$0xff] %v3102_v42  ;;  %2660 = vmatprep.subr.msk.bf16.mxu0 %vm3107_vm9, %v4023_v35  ;;  %vm55_vm11 = vcmp.eq.s32.totalorder %v3022_v19, %v3034_v23  ;;  %v314_v50 = vsub.f32 %v3084_v39, %v313_v43  ;;  %v2475_v51 = vsel %vm53_vm10, 1.0, %v4025_v2  ;;  %vm58_vm13 = vcmp.eq.s32.totalorder %v3025_v20, %v3031_v22 }
  0x11   :  { %v2477_v52 = vsel %vm55_vm11, 1.0, %v4025_v2  ;;  %vm3131_vm12 = vmpackc.low %vm55_vm11, %vm53_vm10  ;;  %v326_v54 = vsub.f32 %v3092_v41, %v325_v47  ;;  %v3143_v55 = vsub.f32 %v2475_v51, %v2475_v51  ;;  %v2480_v57 = vsel %vm58_vm13, 1.0, %v4025_v2 }
  0x12   :  { %2614 = vmatpush1.bf16.msk.msra.mxu1 %vm3131_vm12, %v4023_v35  ;;  %v3145_v56 = vsub.f32 %v2477_v52, %v2477_v52  ;;  %2662 = vmatpush1.bf16.msk.msra.mxu0 %vm3131_vm12, %v4023_v35  ;;  %v315_v58 = vand.u32 4294901760, %v314_v50  ;;  %vm60_vm14 = vcmp.eq.s32.totalorder %v3028_v21, %v3031_v22  ;;  %v3156_v59 = vsub.f32 %v2480_v57, %v2480_v57  ;;  %v4100_v51 = vld [vmem:[#allocation7_spill] sm:$0xff] }
  0x13   :  { %vm57_vm15 = vcmp.eq.s32.totalorder %v3025_v20, %v3034_v23  ;;  %v327_v60 = vand.u32 4294901760, %v326_v54  ;;  %v337_v61 = vand.u32 4294901760, %v3143_v55  ;;  %v2482_v63 = vsel %vm60_vm14, 1.0, %v4025_v2  ;;  %vm3166_vm0 = vmpackc.low %vm60_vm14, %vm58_vm13 }
  0x14   :  { %v349_v62 = vand.u32 4294901760, %v3145_v56  ;;  %2616 = vmatprep.subr.msk.bf16.mxu1 %vm3166_vm0, %v4023_v35  ;;  %v3173_v3 = vsub.f32 %v2482_v63, %v2482_v63  ;;  %2664 = vmatprep.subr.msk.bf16.mxu0 %vm3166_vm0, %v4023_v35  ;;  %vm59_vm1 = vcmp.eq.s32.totalorder %v3028_v21, %v3034_v23  ;;  %v2479_v4 = vsel %vm57_vm15, 1.0, %v4025_v2 }
  0x15   :  { %vm62_vm2 = vcmp.eq.s32.totalorder %v3037_v24, %v3031_v22  ;;  %v2481_v5 = vsel %vm59_vm1, 1.0, %v4025_v2  ;;  %vm3184_vm3 = vmpackc.low %vm59_vm1, %vm57_vm15  ;;  %v3188_v8 = vsub.f32 %v2479_v4, %v2479_v4  ;;  %vm64_vm4 = vcmp.eq.s32.totalorder %v3043_v26, %v3031_v22 }
  0x16   :  { %v2484_v9 = vsel %vm62_vm2, 1.0, %v4025_v2  ;;  %2618 = vmatpush1.bf16.msk.msra.mxu1 %vm3184_vm3, %v4023_v35  ;;  %v3196_v10 = vsub.f32 %v2481_v5, %v2481_v5  ;;  %2666 = vmatpush1.bf16.msk.msra.mxu0 %vm3184_vm3, %v4023_v35  ;;  %v2486_v30 = vsel %vm64_vm4, 1.0, %v4025_v2  ;;  %vm3202_vm7 = vmpackc.low %vm64_vm4, %vm62_vm2  ;;  %vm61_vm8 = vcmp.eq.s32.totalorder %v3037_v24, %v3034_v23 }
  0x17   :  { %v3206_v33 = vsub.f32 %v2484_v9, %v2484_v9  ;;  %2620 = vmatprep.subr.msk.bf16.mxu1 %vm3202_vm7, %v4023_v35  ;;  %v3214_v34 = vsub.f32 %v2486_v30, %v2486_v30  ;;  %2668 = vmatprep.subr.msk.bf16.mxu0 %vm3202_vm7, %v4023_v35  ;;  %vm63_vm10 = vcmp.eq.s32.totalorder %v3043_v26, %v3034_v23  ;;  %v2483_v44 = vsel %vm61_vm8, 1.0, %v4025_v2 }
  0x18   :  { %v2485_v50 = vsel %vm63_vm10, 1.0, %v4025_v2  ;;  %vm3224_vm11 = vmpackc.low %vm63_vm10, %vm61_vm8  ;;  %v3228_v52 = vsub.f32 %v2483_v44, %v2483_v44  ;;  %v264_v54 = vsub.f32 %v3040_v25, %v3087_v40  ;;  %v307_v63 = vand.u32 4294901760, %v3073_v36 }
  0x19   :  { %v3232_v57 = vsub.f32 %v2485_v50, %v2485_v50  ;;  %v319_v23 = vand.u32 4294901760, %v3075_v37  ;;  %v2625_v4 = vpack.c.bf16 %v327_v60, %v315_v58  ;;  %v2673_v30 = vpack.c.bf16 %v325_v47, %v313_v43 }
  0x1a   :  { %2622 = vmatpush1.bf16.msk.msra.mxu1 %vm3224_vm11, %v4023_v35  ;;  %2670 = vmatpush1.bf16.msk.msra.mxu0 %vm3224_vm11, %v4023_v35  ;;  %v3243_v9 = vand.u32 4294901760, %v264_v54  ;;  %v275_v58 = vsub.f32 %v3046_v27, %v3102_v42  ;;  %v308_v44 = vsub.f32 %v3073_v36, %v307_v63  ;;  %v331_v54 = vand.u32 4294901760, %v3117_v48 }
  0x1b   :  { %v397_v60 = vand.u32 4294901760, %v3232_v57  ;;  %v320_v50 = vsub.f32 %v3075_v37, %v319_v23  ;;  %v2671_v0 = vpack.c.bf16 %v319_v23, %v307_v63  ;;  %v343_v35 = vand.u32 4294901760, %v3119_v49 }
  0x1c   :  { %4082 = vst [vmem:[#allocation12_spill] sm:$0xff] %v3243_v9  ;;  %v3254_v5 = vand.u32 4294901760, %v275_v58  ;;  %v338_v45 = vsub.f32 %v3143_v55, %v337_v61  ;;  %v309_v43 = vand.u32 4294901760, %v308_v44  ;;  %v350_v22 = vsub.f32 %v3145_v56, %v349_v62 }
  0x1d   :  { %266 = vmatmul.mubr.f32.vlgmr.msra.gmra.mrb[0].mxu1 %v3243_v9  ;;  %v321_v47 = vand.u32 4294901760, %v320_v50  ;;  %691 = vmatmul.mubr.f32.vlgmr.msra.gmra.mrb[0].mxu0 %v3087_v40  ;;  %v2677_v2 = vpack.c.bf16 %v349_v62, %v337_v61  ;;  %v4083_v27 = vmov 0.0   ;;  %v332_v63 = vsub.f32 %v3117_v48, %v331_v54 }
  0x1e   :  { %2672 = vmatprep.subr.bf16.mxu0 %v2671_v0  ;;  %271 = vmatprep.mubr.f32.mxu1 %v4083_v27  ;;  %v344_v23 = vsub.f32 %v3119_v49, %v343_v35  ;;  %v2675_v58 = vpack.c.bf16 %v343_v35, %v331_v54  ;;  %v339_v25 = vand.u32 4294901760, %v338_v45  ;;  %v351_v44 = vand.u32 4294901760, %v350_v22 }
  0x1f   :  { %v2623_v26 = vpack.c.bf16 %v321_v47, %v309_v43  ;;  %2674 = vmatpush1.bf16.msra.mxu0 %v2673_v30  ;;  %696 = vmatprep.mubr.f32.mxu0 %v4083_v27  ;;  %v3267_v50 = vand.u32 4294901760, %v3049_v28  ;;  %v355_v40 = vand.u32 4294901760, %v3156_v59  ;;  %v333_v61 = vand.u32 4294901760, %v332_v63 }
  0x20   :  { %v345_v0 = vand.u32 4294901760, %v344_v23  ;;  %2676 = vmatprep.subr.bf16.mxu0 %v2675_v58  ;;  %v367_v62 = vand.u32 4294901760, %v3173_v3  ;;  %v4085_v9 = vand.u32 4294901760, %v3188_v8  ;;  %v2629_v45 = vpack.c.bf16 %v351_v44, %v339_v25 }
  0x21   :  { %4084 = vst [vmem:[#allocation13_spill] sm:$0xff] %v3267_v50  ;;  %2624 = vmatprep.subr.bf16.mxu1 %v2623_v26  ;;  %277 = vmatmul.mubr.f32.gmra.mrb[2].mxu1 %v3254_v5  ;;  %v286_v22 = vsub.f32 %v3049_v28, %v3267_v50  ;;  %v356_v30 = vsub.f32 %v3156_v59, %v355_v40  ;;  %v379_v54 = vand.u32 4294901760, %v3206_v33  ;;  %v4088_v44 = vand.u32 4294901760, %v3188_v8 }
  0x22   :  { %v362_v35 = vsub.f32 %v3188_v8, %v4085_v9  ;;  %2626 = vmatpush1.bf16.msra.mxu1 %v2625_v4  ;;  %v2627_v43 = vpack.c.bf16 %v345_v0, %v333_v61  ;;  %700 = vmatmul.mubr.f32.gmra.mrb[2].mxu0 %v3102_v42  ;;  %v368_v47 = vsub.f32 %v3173_v3, %v367_v62  ;;  %v4087_v9 = vand.u32 4294901760, %v3196_v10 }
  0x23   :  { %v2679_v63 = vpack.c.bf16 %v367_v62, %v355_v40  ;;  %2678 = vmatpush1.bf16.msra.mxu0 %v2677_v2  ;;  %282 = vmatprep.mubr.f32.mxu1 %v4083_v27  ;;  %v3282_v26 = vand.u32 4294901760, %v286_v22  ;;  %v357_v25 = vand.u32 4294901760, %v356_v30  ;;  %v3294_v2 = vsub.f32 %v3016_v17, %v3052_v29 }
  0x24   :  { %v363_v23 = vand.u32 4294901760, %v362_v35  ;;  %v374_v58 = vsub.f32 %v3196_v10, %v4087_v9  ;;  %v4089_v4 = vmov %v4087_v9  ;;  %2628 = vmatprep.subr.bf16.mxu1 %v2627_v43  ;;  %705 = vmatprep.mubr.f32.mxu0 %v4083_v27  ;;  %v369_v40 = vand.u32 4294901760, %v368_v47 }
  0x25   :  { %4086 = vst [vmem:[#allocation14_spill] sm:$0xff] %v3282_v26  ;;  %v2681_v61 = vpack.c.bf16 %v4089_v4, %v4088_v44  ;;  %v380_v0 = vsub.f32 %v3206_v33, %v379_v54  ;;  %v391_v62 = vand.u32 4294901760, %v3214_v34  ;;  %288 = vmatmul.mubr.f32.gmra.mrb[4].mxu1 %v3282_v26  ;;  %2680 = vmatprep.subr.bf16.mxu0 %v2679_v63  ;;  %v4090_v22 = vand.u32 4294901760, %v3228_v52 }
  0x26   :  { %v375_v35 = vand.u32 4294901760, %v374_v58  ;;  %v398_v43 = vsub.f32 %v3232_v57, %v397_v60  ;;  %2630 = vmatpush1.bf16.msra.mxu1 %v2629_v45  ;;  %v2631_v17 = vpack.c.bf16 %v369_v40, %v357_v25  ;;  %709 = vmatmul.mubr.f32.gmra.mrb[4].mxu0 %v3267_v50  ;;  %v3307_v44 = vand.u32 4294901760, %v3294_v2  ;;  %v22_v25 = vld [vmem:[%s4017_s1] sm:$0x3] }
  0x27   :  { %v386_v30 = vsub.f32 %v3228_v52, %v4090_v22  ;;  %v4091_v47 = vmov %v4090_v22  ;;  %v381_v4 = vand.u32 4294901760, %v380_v0  ;;  %v392_v63 = vsub.f32 %v3214_v34, %v391_v62  ;;  %2682 = vmatpush1.bf16.msra.mxu0 %v2681_v61  ;;  %293 = vmatprep.mubr.f32.mxu1 %v4083_v27 }
  0x28   :  { %v2685_v9 = vpack.c.bf16 %v397_v60, %v4091_v47  ;;  %4092 = vst [vmem:[#allocation15_spill] sm:$0xff] %v3307_v44  ;;  %v2633_v58 = vpack.c.bf16 %v375_v35, %v363_v23  ;;  %v2683_v22 = vpack.c.bf16 %v391_v62, %v379_v54  ;;  %v399_v26 = vand.u32 4294901760, %v398_v43  ;;  %2632 = vmatprep.subr.bf16.mxu1 %v2631_v17  ;;  %v23_v23 = vld [vmem:[%s4018_s2] sm:$0x3] }
  0x29   :  { %v387_v42 = vand.u32 4294901760, %v386_v30  ;;  %714 = vmatprep.mubr.f32.mxu0 %v4083_v27  ;;  %v297_v60 = vsub.f32 %v3294_v2, %v3307_v44  ;;  %v393_v45 = vand.u32 4294901760, %v392_v63  ;;  %v2639_v0 = vpack.c.bf16 %v3075_v37, %v3073_v36  ;;  %v37_v37 = vld [vmem:[%s4020_s4] sm:$0xff] }
  0x2a   :  { %2684 = vmatprep.subr.bf16.mxu0 %v2683_v22  ;;  %2634 = vmatpush1.bf16.msra.mxu1 %v2633_v58  ;;  %v3327_v62 = vrot.slane %v22_v25, %v3014_v16  ;;  %v3331_v35 = vrot.slane %v22_v25, %v3011_v15  ;;  %v160_v30 = vrot.slane %v23_v23, %v3011_v15  ;;  %vm1768_vm13 = vcmask 31744  }
  0x2b   :  { %v3320_v54 = vand.u32 4294901760, %v297_v60  ;;  %v2635_v61 = vpack.c.bf16 %v393_v45, %v381_v4  ;;  %718 = vmatmul.mubr.f32.gmra.mrb[6].mxu0 %v3307_v44  ;;  %v2637_v40 = vpack.c.bf16 %v399_v26, %v387_v42  ;;  %v4093_v42 = vmov 1.0|1.0   ;;  %v40_v44 = vld [vmem:[%s4020_s4 + $0x18] sm:$0xff] }
  0x2c   :  { %2686 = vmatpush1.bf16.msra.mxu0 %v2685_v9  ;;  %836 = vmatprep.mubr.f32.mxu0 %v4083_v27  ;;  %v2641_v36 = vpack.c.bf16 %v3092_v41, %v3084_v39  ;;  %v2643_v15 = vpack.c.bf16 %v3119_v49, %v3117_v48  ;;  %v156_v26 = vrot.slane %v23_v23, %v3014_v16  ;;  %v3372_v16 = vsel %vm1768_vm13, %v37_v37, 0 }
  0x2d   :  { %299 = vmatmul.mubr.f32.gmra.mrb[6].mxu1 %v3320_v54  ;;  %2636 = vmatprep.subr.bf16.mxu1 %v2635_v61  ;;  %vm3348_vm14 = vcmp.eq.s32.totalorder %v2999_v7, %v160_v30  ;;  %v2645_v39 = vpack.c.bf16 %v3145_v56, %v3143_v55  ;;  %v2647_v41 = vpack.c.bf16 %v3173_v3, %v3156_v59 }
  0x2e   :  { %449 = vmatprep.mubr.f32.mxu1 %v4083_v27  ;;  %2688 = vmatprep.subr.msk.bf16.mxu0 %vm3064_vm5, %v4093_v42  ;;  %vm1781_vm5 = vcmask 1043456   ;;  %vm105_vm15 = vcmp.eq.s32.totalorder %v2999_v7, %v3327_v62  ;;  %vm106_vm1 = vcmp.eq.s32.totalorder %v2999_v7, %v3331_v35  ;;  %vm107_vm2 = vcmp.eq.s32.totalorder %v3008_v14, %v3327_v62 }
  0x2f   :  { %2638 = vmatpush1.bf16.msra.mxu1 %v2637_v40  ;;  %838 = vmatmul.mubr.f32.vlgmr.msra.gmra.mrb[0].mxu0 %v3001_v11  ;;  %v2488_v38 = vsel %vm106_vm1, 1.0, %v4083_v27  ;;  %v3386_v48 = vsel %vm3348_vm14, 1.0, %v4083_v27  ;;  %v2487_v49 = vsel %vm105_vm15, 1.0, %v4083_v27  ;;  %v2489_v56 = vsel %vm107_vm2, 1.0, %v4083_v27 }
  0x30   :  { %2640 = vmatprep.subr.bf16.mxu1 %v2639_v0  ;;  %2690 = vmatpush1.bf16.msk.msra.mxu0 %vm3080_vm6, %v4093_v42  ;;  %vm108_vm6 = vcmp.eq.s32.totalorder %v3008_v14, %v3331_v35  ;;  %v1786_v55 = vsel %vm1781_vm5, %v3386_v48, 0  ;;  %vm110_vm4 = vcmp.eq.s32.totalorder %v3019_v18, %v3331_v35  ;;  %v2649_v3 = vpack.c.bf16 %v3196_v10, %v3188_v8 }
  0x31   :  { %843 = vmatprep.mubr.f32.mxu0 %v4083_v27  ;;  %2692 = vmatprep.subr.msk.bf16.mxu0 %vm3107_vm9, %v4093_v42  ;;  %v2490_v46 = vsel %vm108_vm6, 1.0, %v4083_v27  ;;  %vm3400_vm9 = vcmp.eq.s32.totalorder %v2999_v7, %v156_v26  ;;  %v2651_v43 = vpack.c.bf16 %v3214_v34, %v3206_v33  ;;  %v2653_v47 = vpack.c.bf16 %v3232_v57, %v3228_v52 }
  0x32   :  { %451 = vmatmul.mubr.f32.vlgmr.msra.gmra.mrb[0].mxu1 %v3001_v11  ;;  %v2492_v9 = vsel %vm110_vm4, 1.0, %v4083_v27  ;;  %v3421_v17 = vsub.f32 %v2488_v38, %v2488_v38  ;;  %v3423_v8 = vsub.f32 %v2490_v46, %v2490_v46  ;;  %v3425_v10 = vsub.f32 %v2487_v49, %v2487_v49 }
  0x33   :  { %2642 = vmatpush1.bf16.msra.mxu1 %v2641_v36  ;;  %456 = vmatprep.mubr.f32.mxu1 %v4083_v27  ;;  %v3428_v33 = vand.u32 4294901760, %v3372_v16  ;;  %v3434_v34 = vsub.f32 %v1786_v55, %v1786_v55  ;;  %v3436_v53 = vsub.f32 %v2489_v56, %v2489_v56  ;;  %v3441_v52 = vsel %vm3400_vm9, 1.0, %v4083_v27  ;;  %v38_v55 = vld [vmem:[%s4020_s4 + $0x8] sm:$0xff] }
  0x34   :  { %2644 = vmatprep.subr.bf16.mxu1 %v2643_v15  ;;  %845 = vmatmul.mubr.f32.gmra.mrb[2].mxu0 %v3003_v12  ;;  %v1783_v57 = vsel %vm1781_vm5, %v3441_v52, 0  ;;  %v3452_v4 = vsub.f32 %v2492_v9, %v2492_v9  ;;  %vm111_vm8 = vcmp.eq.s32.totalorder %v3022_v19, %v3327_v62  ;;  %vm114_vm10 = vcmp.eq.s32.totalorder %v3025_v20, %v3331_v35 }
  0x35   :  { %2694 = vmatpush1.bf16.msk.msra.mxu0 %vm3131_vm12, %v4093_v42  ;;  %850 = vmatprep.mubr.f32.mxu0 %v4083_v27  ;;  %vm112_vm12 = vcmp.eq.s32.totalorder %v3022_v19, %v3331_v35  ;;  %vm116_vm14 = vcmp.eq.s32.totalorder %v3028_v21, %v3331_v35  ;;  %v2493_v58 = vsel %vm111_vm8, 1.0, %v4083_v27  ;;  %v2496_v22 = vsel %vm114_vm10, 1.0, %v4083_v27 }
  0x36   :  { %458 = vmatmul.mubr.f32.gmra.mrb[2].mxu1 %v3003_v12  ;;  %2696 = vmatprep.subr.msk.bf16.mxu0 %vm3166_vm0, %v4093_v42  ;;  %v2494_v1 = vsel %vm112_vm12, 1.0, %v4083_v27  ;;  %vm109_vm0 = vcmp.eq.s32.totalorder %v3019_v18, %v3327_v62  ;;  %v2498_v60 = vsel %vm116_vm14, 1.0, %v4083_v27  ;;  %v3489_v6 = vsub.f32 %v1783_v57, %v1783_v57 }
  0x37   :  { %2646 = vmatpush1.bf16.msra.mxu1 %v2645_v39  ;;  %463 = vmatprep.mubr.f32.mxu1 %v4083_v27  ;;  %v2491_v63 = vsel %vm109_vm0, 1.0, %v4083_v27  ;;  %v3491_v45 = vsub.f32 %v2494_v1, %v2494_v1  ;;  %vm4037_vm9 = vcmp.eq.s32.totalorder %v3028_v21, %v3327_v62  ;;  %v4039_v61 = vand.u32 4294901760, %v3421_v17 }
  0x38   :  { %2648 = vmatprep.subr.bf16.mxu1 %v2647_v41  ;;  %852 = vmatmul.mubr.f32.gmra.mrb[4].mxu0 %v3005_v13  ;;  %v3500_v23 = vsub.f32 %v2491_v63, %v2491_v63  ;;  %v2497_v31 = vsel %vm4037_vm9, 1.0, %v4083_v27  ;;  %v4038_v40 = vand.u32 4294901760, %v3423_v8  ;;  %v3509_v0 = vsub.f32 %v2493_v58, %v2493_v58  ;;  %v39_v63 = vld [vmem:[%s4020_s4 + $0x10] sm:$0xff]  ;;  %s2950_s4 = smov [#allocation2]  }
  0x39   :  { %2698 = vmatpush1.bf16.msk.msra.mxu0 %vm3184_vm3, %v4093_v42  ;;  %857 = vmatprep.mubr.f32.mxu0 %v4083_v27  ;;  %vm113_vm3 = vcmp.eq.s32.totalorder %v3025_v20, %v3327_v62  ;;  %v3511_v30 = vsub.f32 %v2496_v22, %v2496_v22  ;;  %v3513_v36 = vsub.f32 %v2498_v60, %v2498_v60  ;;  %v4044_v37 = vand.u32 4294901760, %v3434_v34  ;;  %v4105_v58 = vld [vmem:[#allocation6_spill] sm:$0xff]  ;;  %s2463_s11 = sshll.u32 %s2950_s4, 4  ;;  %s2464_s11 = int_to_ptr.vmem [resolvable:$true] %s2463_s11 }
  0x3a   :  { %465 = vmatmul.mubr.f32.gmra.mrb[4].mxu1 %v3005_v13  ;;  %2700 = vmatprep.subr.msk.bf16.mxu0 %vm3202_vm7, %v4093_v42  ;;  %v2495_v25 = vsel %vm113_vm3, 1.0, %v4083_v27  ;;  %vm3526_vm7 = vmpackc.low %vm108_vm6, %vm106_vm1  ;;  %vm118_vm9 = vcmp.eq.s32.totalorder %v3037_v24, %v3331_v35  ;;  %v3539_v32 = vsub.f32 %v2497_v31, %v2497_v31  ;;  %v3547_v41 = vsub.f32 %v3372_v16, %v3428_v33  ;;  %s2923_s12 = scalar_lea.vmem %s2464_s11, 32  ;;  %p2928_p1 = scmp.lt.s32.totalorder %s2464_s11, %s2464_s11 }
  0x3b   :  { %2650 = vmatpush1.bf16.msra.mxu1 %v2649_v3  ;;  %470 = vmatprep.mubr.f32.mxu1 %v4083_v27  ;;  %v3530_v26 = vsub.f32 %v2495_v25, %v2495_v25  ;;  %v2500_v39 = vsel %vm118_vm9, 1.0, %v4083_v27  ;;  %v1902_v38 = vsub.f32 %v3434_v34, %v4044_v37  ;;  %vm117_vm1 = vcmp.eq.s32.totalorder %v3037_v24, %v3327_v62  ;;  %vm3575_vm6 = vmpackc.low %vm107_vm2, %vm105_vm15  ;;  %p2924_p0 = scmp.ne.s32.totalorder %s2464_s11, %s2923_s12  ;;  %p2929_p2 = scmp.lt.s32.totalorder %s2923_s12, %s2923_s12 }
  0x3c   :  { %2652 = vmatprep.subr.bf16.mxu1 %v2651_v43  ;;  %859 = vmatmul.mubr.f32.gmra.mrb[6].mxu0 %v3052_v29  ;;  %v1102_v46 = vsub.f32 %v3421_v17, %v4039_v61  ;;  %v1114_v49 = vsub.f32 %v3423_v8, %v4038_v40  ;;  %v4043_v16 = vand.u32 4294901760, %v3425_v10  ;;  %v4041_v3 = vand.u32 4294901760, %v3436_v53  ;;  %vm3591_vm15 = vmpackc.low %vm112_vm12, %vm110_vm4 }
  0x3d   :  { %2702 = vmatpush1.bf16.msk.msra.mxu0 %vm3224_vm11, %v4093_v42  ;;  %945 = vmatprep.mubr.f32.mxu0 %v4083_v27  ;;  %vm120_vm11 = vcmp.eq.s32.totalorder %v4100_v51, %v3331_v35  ;;  %v1903_v59 = vand.u32 4294901760, %v1902_v38  ;;  %v4040_v43 = vand.u32 4294901760, %v3452_v4  ;;  %v3599_v57 = vsub.f32 %v2500_v39, %v2500_v39  ;;  %vm3637_vm4 = vmpackc.low %vm111_vm8, %vm109_vm0  ;;  %p2930_p3 = por %p2929_p2, %p2928_p1 }
  0x3e   :  { %472 = vmatmul.mubr.f32.gmra.mrb[6].mxu1 %v3052_v29  ;;  %2601 = vmatprep.subr.msk.mxu0 %vm1781_vm5, %v3386_v48  ;;  %v2502_v9 = vsel %vm120_vm11, 1.0, %v4083_v27  ;;  %vm119_vm2 = vcmp.eq.s32.totalorder %v4100_v51, %v3327_v62  ;;  %v2499_v1 = vsel %vm117_vm1, 1.0, %v4083_v27  ;;  %v4048_v60 = vand.u32 4294901760, %v3547_v41  ;;  %vm3658_vm12 = vmpackc.low %vm116_vm14, %vm114_vm10 }
  0x3f   :  { %2654 = vmatpush1.bf16.msra.mxu1 %v2653_v47  ;;  %574 = vmatprep.mubr.f32.mxu1 %v4083_v27  ;;  %v4042_v47 = vand.u32 4294901760, %v3491_v45  ;;  %v2501_v22 = vsel %vm119_vm2, 1.0, %v4083_v27  ;;  %v1773_v31 = vsel %vm1768_vm13, %v38_v55, 0  ;;  %v1103_v39 = vand.u32 4294901760, %v1102_v46  ;;  %vm3716_vm10 = vmpackc.low %vm120_vm11, %vm118_vm9  ;;  %p2931_p4 = pnand %p2930_p3, %p2924_p0 }
  0x40   :  { %947 = vmatmul.mubr.f32.vlgmr.msra.gmra.mrb[0].mxu0 %v3001_v11  ;;  %2704 = vmatprep.subr.msk.bf16.mxu1 %vm3526_vm7, %v4093_v42  ;;  %v1115_v38 = vand.u32 4294901760, %v1114_v49  ;;  %v1108_v40 = vsub.f32 %v3425_v10, %v4043_v16  ;;  %v3625_v61 = vand.u32 4294901760, %v1773_v31  ;;  %v4106_v46 = vmov 0  ;;  %v4112_v16 = vld [vmem:[#allocation8_spill] sm:$0xff]  ;;  %vm3751_vm14 = vmpackc.low %vm119_vm2, %vm117_vm1 }
  0x41   :  { %2602 = vmatpush1.msk.msra.mxu0 %vm1781_vm5, %v3441_v52  ;;  %952 = vmatprep.mubr.f32.mxu0 %v4083_v27  ;;  %v4107_v46 = vsel %vm3637_vm4, 4294967295, %v4106_v46  ;;  %v1120_v49 = vsub.f32 %v3436_v53, %v4041_v3  ;;  %v1126_v55 = vsub.f32 %v3452_v4, %v4040_v43  ;;  %v1776_v18 = vsel %vm1768_vm13, %v39_v63, 0 }
  0x42   :  { %577 = vmatmul.mubr.f32.vlgmr.msra.gmra.mrb[0].mxu1 %v4105_v58  ;;  %1904 = vmatprep.subr.mxu0 %v1903_v59  ;;  %4108 = vst [vmem:[#allocation7_spill] sm:$0xff] %v4107_v46  ;;  %v1138_v59 = vsub.f32 %v3491_v45, %v4042_v47  ;;  %v4109_v19 = vmov 0  ;;  %v3663_v43 = vsub.f32 %v1773_v31, %v3625_v61  ;;  %v3667_v63 = vand.u32 4294901760, %v1776_v18 }
  0x43   :  { %2706 = vmatpush1.bf16.msk.msra.mxu1 %vm3575_vm6, %v4093_v42  ;;  %582 = vmatprep.mubr.f32.mxu1 %v4083_v27  ;;  %v4110_v19 = vsel %vm3658_vm12, 4294967295, %v4109_v19  ;;  %v3670_v37 = vsub.f32 %v2502_v9, %v2502_v9  ;;  %v1858_v25 = vsub.f32 %v3547_v41, %v4048_v60  ;;  %v3681_v31 = vsub.f32 %v2499_v1, %v2499_v1 }
  0x44   :  { %954 = vmatmul.mubr.f32.gmra.mrb[2].mxu0 %v3003_v12  ;;  %2708 = vmatprep.subr.msk.bf16.mxu1 %vm3591_vm15, %v4093_v42  ;;  %4111 = vst [vmem:[#allocation6_spill] sm:$0xff] %v4110_v19  ;;  %v3683_v47 = vsub.f32 %v2501_v22, %v2501_v22  ;;  %v1109_v9 = vand.u32 4294901760, %v1108_v40  ;;  %v4113_v3 = vand.u32 4294901760, %v3489_v6  ;;  %vm4114_vm0 = vcmp.eq.s32.totalorder %v3028_v21, %v3327_v62 }
  0x45   :  { %959 = vmatprep.mubr.f32.mxu0 %v4083_v27  ;;  %vm3698_vm8 = vmpackc.low %vm4114_vm0, %vm113_vm3  ;;  %v4115_v1 = vmov 0  ;;  %v2719_v40 = vpack.c.bf16 %v1115_v38, %v1103_v39  ;;  %v1121_v22 = vand.u32 4294901760, %v1120_v49  ;;  %v3704_v60 = vsub.f32 %v1776_v18, %v3667_v63 }
  0x46   :  { %585 = vmatmul.mubr.f32.gmra.mrb[2].mxu1 %v4112_v16  ;;  %v1908_v50 = vsub.f32 %v3489_v6, %v4113_v3  ;;  %v4116_v1 = vsel %vm3698_vm8, 4294967295, %v4115_v1  ;;  %v4118_v20 = vmov 0  ;;  %v1127_v21 = vand.u32 4294901760, %v1126_v55 }
  0x47   :  { %2710 = vmatpush1.bf16.msk.msra.mxu1 %vm3637_vm4, %v4093_v42  ;;  %590 = vmatprep.mubr.f32.mxu1 %v4083_v27  ;;  %4117 = vst [vmem:[#allocation16_spill] sm:$0xff] %v4116_v1  ;;  %v4119_v20 = vsel %vm3716_vm10, 4294967295, %v4118_v20  ;;  %v1139_v39 = vand.u32 4294901760, %v1138_v59  ;;  %v4121_v38 = vand.u32 4294901760, %v3500_v23  ;;  %v4122_v18 = vand.u32 4294901760, %v3509_v0 }
  0x48   :  { %961 = vmatmul.mubr.f32.gmra.mrb[4].mxu0 %v3005_v13  ;;  %2712 = vmatprep.subr.msk.bf16.mxu1 %vm3658_vm12, %v4093_v42  ;;  %4120 = vst [vmem:[#allocation17_spill] sm:$0xff] %v4119_v20  ;;  %v1859_v7 = vand.u32 4294901760, %v1858_v25  ;;  %v4123_v19 = vand.u32 4294901760, %v3511_v30  ;;  %v4124_v46 = vand.u32 4294901760, %v3513_v36  ;;  %v4058_v25 = vand.u32 4294901760, %v3670_v37 }
  0x49   :  { %966 = vmatprep.mubr.f32.mxu0 %v4083_v27  ;;  %v1132_v49 = vsub.f32 %v3500_v23, %v4121_v38  ;;  %v1144_v3 = vsub.f32 %v3509_v0, %v4122_v18  ;;  %v1909_v38 = vand.u32 4294901760, %v1908_v50  ;;  %v2721_v24 = vpack.c.bf16 %v1121_v22, %v1109_v9 }
  0x4a   :  { %593 = vmatmul.mubr.f32.gmra.mrb[4].mxu1 %v3049_v28  ;;  %v1150_v35 = vsub.f32 %v3511_v30, %v4123_v19  ;;  %v1162_v55 = vsub.f32 %v3513_v36, %v4124_v46  ;;  %v1779_v28 = vsel %vm1768_vm13, %v40_v44, 0  ;;  %v4127_v46 = vand.u32 4294901760, %v3663_v43 }
  0x4b   :  { %2714 = vmatpush1.bf16.msk.msra.mxu1 %vm3698_vm8, %v4093_v42  ;;  %598 = vmatprep.mubr.f32.mxu1 %v4083_v27  ;;  %v3760_v18 = vand.u32 4294901760, %v1779_v28  ;;  %v2723_v59 = vpack.c.bf16 %v1139_v39, %v1127_v21  ;;  %v1133_v20 = vand.u32 4294901760, %v1132_v49  ;;  %v1145_v62 = vand.u32 4294901760, %v1144_v3 }
  0x4c   :  { %968 = vmatmul.mubr.f32.gmra.mrb[6].mxu0 %v3052_v29  ;;  %2716 = vmatprep.subr.msk.bf16.mxu1 %vm3716_vm10, %v4093_v42  ;;  %v1869_v44 = vsub.f32 %v3663_v43, %v4127_v46  ;;  %v1151_v51 = vand.u32 4294901760, %v1150_v35  ;;  %v1163_v1 = vand.u32 4294901760, %v1162_v55  ;;  %v4128_v16 = vand.u32 4294901760, %v3530_v26 }
  0x4d   :  { %1854 = vmatprep.mubr.f32.mxu0 %v4083_v27  ;;  %v3768_v19 = vsub.f32 %v1779_v28, %v3760_v18  ;;  %v4129_v9 = vand.u32 4294901760, %v3539_v32  ;;  %v4130_v3 = vand.u32 4294901760, %v3599_v57  ;;  %v4131_v49 = vand.u32 4294901760, %v3704_v60 }
  0x4e   :  { %601 = vmatmul.mubr.f32.gmra.mrb[6].mxu1 %v3294_v2  ;;  %v1156_v46 = vsub.f32 %v3530_v26, %v4128_v16  ;;  %v1870_v28 = vand.u32 4294901760, %v1869_v44  ;;  %v1186_v55 = vsub.f32 %v3670_v37, %v4058_v25  ;;  %v2725_v39 = vpack.c.bf16 %v1145_v62, %v1133_v20 }
  0x4f   :  { %2718 = vmatpush1.bf16.msk.msra.mxu1 %vm3751_vm14, %v4093_v42  ;;  %1054 = vmatprep.mubr.f32.mxu1 %v4083_v27  ;;  %v1168_v22 = vsub.f32 %v3539_v32, %v4129_v9  ;;  %v1174_v21 = vsub.f32 %v3599_v57, %v4130_v3  ;;  %v1880_v35 = vsub.f32 %v3704_v60, %v4131_v49  ;;  %v1890_v9 = vand.u32 4294901760, %v3768_v19  ;;  %v4132_v3 = vld [vmem:[#allocation12_spill] sm:$0xff] }
  0x50   :  { %2720 = vmatprep.subr.bf16.mxu1 %v2719_v40  ;;  %1860 = vmatmul.mubr.f32.vlgmr.msra.gmra.mrb[8].mxu0 %v1859_v7  ;;  %v2727_v16 = vpack.c.bf16 %v1163_v1, %v1151_v51  ;;  %v1157_v7 = vand.u32 4294901760, %v1156_v46  ;;  %v4133_v44 = vand.u32 4294901760, %v3681_v31  ;;  %v4134_v25 = vand.u32 4294901760, %v3683_v47 }
  0x51   :  { %1910 = vmatpush1.msra.mxu0 %v1909_v38  ;;  %1865 = vmatprep.mubr.f32.mxu0 %v4083_v27  ;;  %v1169_v40 = vand.u32 4294901760, %v1168_v22  ;;  %v1175_v20 = vand.u32 4294901760, %v1174_v21  ;;  %v1187_v1 = vand.u32 4294901760, %v1186_v55  ;;  %v4135_v22 = vld [vmem:[#allocation14_spill] sm:$0xff]  ;;  %v2747_v55 = vpack.c.bf16 %v3670_v37, %v3599_v57 }
  0x52   :  { %1060 = vmatmul.mubr.f32.vlgmr.msra.gmra.mrb[8].mxu1 %v4132_v3  ;;  %2004 = vmatprep.subr.mxu0 %v3434_v34  ;;  %v1180_v49 = vsub.f32 %v3681_v31, %v4133_v44  ;;  %v1192_v38 = vsub.f32 %v3683_v47, %v4134_v25  ;;  %v1881_v3 = vand.u32 4294901760, %v1880_v35  ;;  %v2745_v35 = vpack.c.bf16 %v3539_v32, %v3530_v26  ;;  %v4137_v44 = vld [vmem:[#allocation8_spill] sm:$0xff] }
  0x53   :  { %2722 = vmatpush1.bf16.msra.mxu1 %v2721_v24  ;;  %1065 = vmatprep.mubr.f32.mxu1 %v4083_v27  ;;  %v1891_v24 = vsub.f32 %v3768_v19, %v1890_v9  ;;  %v2729_v62 = vpack.c.bf16 %v1169_v40, %v1157_v7  ;;  %v2749_v7 = vpack.c.bf16 %v3683_v47, %v3681_v31  ;;  %v4136_v40 = vand.u32 4294901760, %v3434_v34 }
  0x54   :  { %2724 = vmatprep.subr.bf16.mxu1 %v2723_v59  ;;  %1871 = vmatmul.mubr.f32.gmra.mrb[10].mxu0 %v1870_v28  ;;  %v1181_v51 = vand.u32 4294901760, %v1180_v49  ;;  %v1193_v46 = vand.u32 4294901760, %v1192_v38  ;;  %v2731_v59 = vpack.c.bf16 %v1187_v1, %v1175_v20  ;;  %v2743_v28 = vpack.c.bf16 %v3513_v36, %v3511_v30  ;;  %v4140_v49 = vld [vmem:[#allocation9_spill] sm:$0xff] }
  0x55   :  { %1876 = vmatprep.mubr.f32.mxu0 %v4083_v27  ;;  %v1892_v25 = vand.u32 4294901760, %v1891_v24  ;;  %v4143_v20 = vand.u32 4294901760, %v3421_v17  ;;  %v4144_v1 = vand.u32 4294901760, %v3423_v8 }
  0x56   :  { %1071 = vmatmul.mubr.f32.gmra.mrb[10].mxu1 %v3254_v5  ;;  %v2733_v21 = vpack.c.bf16 %v1193_v46, %v1181_v51  ;;  %v2735_v5 = vpack.c.bf16 %v3423_v8, %v3421_v17  ;;  %v4146_v51 = vand.u32 4294901760, %v3436_v53  ;;  %v4147_v17 = vand.u32 4294901760, %v3547_v41 }
  0x57   :  { %2726 = vmatpush1.bf16.msra.mxu1 %v2725_v39  ;;  %1076 = vmatprep.mubr.f32.mxu1 %v4083_v27  ;;  %v2737_v39 = vpack.c.bf16 %v3436_v53, %v3425_v10  ;;  %v2767_v24 = vpack.c.bf16 %v4144_v1, %v4143_v20  ;;  %v4148_v8 = vand.u32 4294901760, %v3452_v4  ;;  %v4153_v53 = vand.u32 4294901760, %v3509_v0 }
  0x58   :  { %2728 = vmatprep.subr.bf16.mxu1 %v2727_v16  ;;  %1882 = vmatmul.mubr.f32.gmra.mrb[12].mxu0 %v1881_v3  ;;  %v2739_v16 = vpack.c.bf16 %v3491_v45, %v3452_v4 }
  0x59   :  { %1887 = vmatprep.mubr.f32.mxu0 %v4083_v27 }
  0x5a   :  { %1082 = vmatmul.mubr.f32.gmra.mrb[12].mxu1 %v4135_v22  ;;  %v4151_v22 = vld [vmem:[#allocation10_spill] sm:$0xff] }
  0x5b   :  { %2730 = vmatpush1.bf16.msra.mxu1 %v2729_v62  ;;  %1087 = vmatprep.mubr.f32.mxu1 %v4083_v27  ;;  %v4145_v62 = vand.u32 4294901760, %v3425_v10  ;;  %v4152_v10 = vand.u32 4294901760, %v3500_v23 }
  0x5c   :  { %2732 = vmatprep.subr.bf16.mxu1 %v2731_v59  ;;  %1893 = vmatmul.mubr.f32.gmra.mrb[14].mxu0 %v1892_v25  ;;  %v4149_v59 = vand.u32 4294901760, %v3491_v45  ;;  %v4150_v25 = vand.u32 4294901760, %v3489_v6  ;;  %v4154_v45 = vand.u32 4294901760, %v3663_v43 }
  0x5d   :  { %1973 = vmatprep.mubr.f32.mxu0 %v4083_v27  ;;  %v2769_v46 = vpack.c.bf16 %v4146_v51, %v4145_v62  ;;  %v2773_v4 = vpack.c.bf16 %v4153_v53, %v4152_v10 }
  0x5e   :  { %1093 = vmatmul.mubr.f32.gmra.mrb[14].mxu1 %v3320_v54  ;;  %v2741_v54 = vpack.c.bf16 %v3509_v0, %v3500_v23  ;;  %v4158_v23 = vand.u32 4294901760, %v3530_v26  ;;  %v4159_v0 = vand.u32 4294901760, %v3539_v32  ;;  %v4164_v26 = vand.u32 4294901760, %v3681_v31 }
  0x5f   :  { %2734 = vmatpush1.bf16.msra.mxu1 %v2733_v21  ;;  %1243 = vmatprep.mubr.f32.mxu1 %v4083_v27  ;;  %v4165_v32 = vand.u32 4294901760, %v3683_v47 }
  0x60   :  { %2736 = vmatprep.subr.bf16.mxu1 %v2735_v5  ;;  %1975 = vmatmul.mubr.f32.vlgmr.msra.gmra.mrb[8].mxu0 %v3428_v33  ;;  %v2777_v5 = vpack.c.bf16 %v4159_v0, %v4158_v23 }
  0x61   :  { %2007 = vmatpush1.msra.mxu0 %v3489_v6  ;;  %1980 = vmatprep.mubr.f32.mxu0 %v4083_v27  ;;  %v4155_v6 = vand.u32 4294901760, %v3511_v30  ;;  %v4161_v30 = vand.u32 4294901760, %v3599_v57 }
  0x62   :  { %1245 = vmatmul.mubr.f32.vlgmr.msra.gmra.mrb[8].mxu1 %v3001_v11  ;;  %2603 = vmatprep.subr.msk.mxu0 %vm1781_vm5, %v3386_v48 }
  0x63   :  { %2738 = vmatpush1.bf16.msra.mxu1 %v2737_v39  ;;  %1250 = vmatprep.mubr.f32.mxu1 %v4083_v27 }
  0x64   :  { %2740 = vmatprep.subr.bf16.mxu1 %v2739_v16  ;;  %1982 = vmatmul.mubr.f32.gmra.mrb[10].mxu0 %v3625_v61  ;;  %v4163_v16 = vld [vmem:[#allocation13_spill] sm:$0xff] }
  0x65   :  { %1987 = vmatprep.mubr.f32.mxu0 %v4083_v27 }
  0x66   :  { %1252 = vmatmul.mubr.f32.gmra.mrb[10].mxu1 %v3003_v12 }
  0x67   :  { %2742 = vmatpush1.bf16.msra.mxu1 %v2741_v54  ;;  %1257 = vmatprep.mubr.f32.mxu1 %v4083_v27  ;;  %v2781_v54 = vpack.c.bf16 %v4165_v32, %v4164_v26 }
  0x68   :  { %2744 = vmatprep.subr.bf16.mxu1 %v2743_v28  ;;  %1989 = vmatmul.mubr.f32.gmra.mrb[12].mxu0 %v3667_v63 }
  0x69   :  { %1994 = vmatprep.mubr.f32.mxu0 %v4083_v27 }
  0x6a   :  { %1259 = vmatmul.mubr.f32.gmra.mrb[12].mxu1 %v3005_v13 }
  0x6b   :  { %2746 = vmatpush1.bf16.msra.mxu1 %v2745_v35  ;;  %1264 = vmatprep.mubr.f32.mxu1 %v4083_v27 }
  0x6c   :  { %2748 = vmatprep.subr.bf16.mxu1 %v2747_v55  ;;  %1996 = vmatmul.mubr.f32.gmra.mrb[14].mxu0 %v3760_v18 }
  0x6d   :  { %2070 = vmatprep.mubr.f32.mxu0 %v4083_v27 }
  0x6e   :  { %1266 = vmatmul.mubr.f32.gmra.mrb[14].mxu1 %v3052_v29 }
  0x6f   :  { %2750 = vmatpush1.bf16.msra.mxu1 %v2749_v7  ;;  %1368 = vmatprep.mubr.f32.mxu1 %v4083_v27 }
  0x70   :  { %2752 = vmatprep.subr.msk.bf16.mxu1 %vm3526_vm7, %v4093_v42  ;;  %2073 = vmatmul.mubr.f32.vlgmr.msra.gmra.mrb[8].mxu0 %v3547_v41  ;;  %v4156_v41 = vand.u32 4294901760, %v3513_v36  ;;  %v4162_v36 = vand.u32 4294901760, %v3670_v37  ;;  %v4166_v37 = vld [vmem:[#allocation15_spill] sm:$0xff] }
  0x71   :  { %2604 = vmatpush1.msk.msra.mxu0 %vm1781_vm5, %v3441_v52  ;;  %2078 = vmatprep.mubr.f32.mxu0 %v4083_v27 }
  0x72   :  { %1371 = vmatmul.mubr.f32.vlgmr.msra.gmra.mrb[8].mxu1 %v4105_v58  ;;  %2209 = vmatprep.subr.mxu0 %v4136_v40  ;;  %v2775_v21 = vpack.c.bf16 %v4156_v41, %v4155_v6  ;;  %v2779_v39 = vpack.c.bf16 %v4162_v36, %v4161_v30 }
  0x73   :  { %2754 = vmatpush1.bf16.msk.msra.mxu1 %vm3575_vm6, %v4093_v42  ;;  %1376 = vmatprep.mubr.f32.mxu1 %v4083_v27 }
  0x74   :  { %2756 = vmatprep.subr.msk.bf16.mxu1 %vm3591_vm15, %v4093_v42  ;;  %2081 = vmatmul.mubr.f32.gmra.mrb[10].mxu0 %v3663_v43  ;;  %v4160_v43 = vand.u32 4294901760, %v3704_v60 }
  0x75   :  { %2086 = vmatprep.mubr.f32.mxu0 %v4083_v27 }
  0x76   :  { %1379 = vmatmul.mubr.f32.gmra.mrb[10].mxu1 %v4137_v44 }
  0x77   :  { %2758 = vmatpush1.bf16.msk.msra.mxu1 %vm3637_vm4, %v4093_v42  ;;  %1384 = vmatprep.mubr.f32.mxu1 %v4083_v27 }
  0x78   :  { %2760 = vmatprep.subr.msk.bf16.mxu1 %vm3658_vm12, %v4093_v42  ;;  %2089 = vmatmul.mubr.f32.gmra.mrb[12].mxu0 %v3704_v60 }
  0x79   :  { %2094 = vmatprep.mubr.f32.mxu0 %v4083_v27 }
  0x7a   :  { %1387 = vmatmul.mubr.f32.gmra.mrb[12].mxu1 %v4140_v49 }
  0x7b   :  { %2762 = vmatpush1.bf16.msk.msra.mxu1 %vm3698_vm8, %v4093_v42  ;;  %1392 = vmatprep.mubr.f32.mxu1 %v4083_v27 }
  0x7c   :  { %2764 = vmatprep.subr.msk.bf16.mxu1 %vm3716_vm10, %v4093_v42  ;;  %2097 = vmatmul.mubr.f32.gmra.mrb[14].mxu0 %v3768_v19 }
  0x7d   :  { %2169 = vmatprep.mubr.f32.mxu0 %v4083_v27 }
  0x7e   :  { %1395 = vmatmul.mubr.f32.gmra.mrb[14].mxu1 %v3294_v2  ;;  %v2771_v2 = vpack.c.bf16 %v4149_v59, %v4148_v8 }
  0x7f   :  { %2766 = vmatpush1.bf16.msk.msra.mxu1 %vm3751_vm14, %v4093_v42  ;;  %1481 = vmatprep.mubr.f32.mxu1 %v4083_v27 }
  0x80   :  { %2768 = vmatprep.subr.bf16.mxu1 %v2767_v24  ;;  %2173 = vmatmul.mubr.f32.vlgmr.msra.gmra.mrb[8].mxu0 %v4147_v17 }
  0x81   :  { %2213 = vmatpush1.msra.mxu0 %v4150_v25  ;;  %2178 = vmatprep.mubr.f32.mxu0 %v4083_v27 }
  0x82   :  { %1485 = vmatmul.mubr.f32.vlgmr.msra.gmra.mrb[8].mxu1 %v4151_v22  ;;  %2605 = vmatprep.subr.msk.mxu0 %vm1781_vm5, %v3386_v48  ;;  %v4157_v48 = vld [vmem:[#allocation11_spill] sm:$0xff] }
  0x83   :  { %2770 = vmatpush1.bf16.msra.mxu1 %v2769_v46  ;;  %1490 = vmatprep.mubr.f32.mxu1 %v4083_v27 }
  0x84   :  { %2772 = vmatprep.subr.bf16.mxu1 %v2771_v2  ;;  %2182 = vmatmul.mubr.f32.gmra.mrb[10].mxu0 %v4154_v45 }
  0x85   :  { %2187 = vmatprep.mubr.f32.mxu0 %v4083_v27 }
  0x86   :  { %1494 = vmatmul.mubr.f32.gmra.mrb[10].mxu1 %v4157_v48 }
  0x87   :  { %2774 = vmatpush1.bf16.msra.mxu1 %v2773_v4  ;;  %1499 = vmatprep.mubr.f32.mxu1 %v4083_v27 }
  0x88   :  { %2776 = vmatprep.subr.bf16.mxu1 %v2775_v21  ;;  %2191 = vmatmul.mubr.f32.gmra.mrb[12].mxu0 %v4160_v43 }
  0x89   :  { %2196 = vmatprep.mubr.f32.mxu0 %v4083_v27 }
  0x8a   :  { %1503 = vmatmul.mubr.f32.gmra.mrb[12].mxu1 %v4163_v16 }
  0x8b   :  { %2778 = vmatpush1.bf16.msra.mxu1 %v2777_v5  ;;  %1508 = vmatprep.mubr.f32.mxu1 %v4083_v27 }
  0x8c   :  { %2780 = vmatprep.subr.bf16.mxu1 %v2779_v39  ;;  %2200 = vmatmul.mubr.f32.gmra.mrb[14].mxu0 %v1890_v9 }
  0x8d   :  { %2276 = vmatprep.mubr.f32.mxu0 %v4083_v27 }
  0x8e   :  { %1512 = vmatmul.mubr.f32.gmra.mrb[14].mxu1 %v4166_v37 }
  0x8f   :  { %2782 = vmatpush1.bf16.msra.mxu1 %v2781_v54  ;;  %1630 = vmatprep.mubr.f32.mxu1 %v4083_v27 }
  0x90   :  { %2784 = vmatprep.subr.msk.bf16.mxu1 %vm3526_vm7, %v4093_v42  ;;  %2278 = vmatmul.mubr.f32.vlgmr.msra.gmra.mrb[8].mxu0 %v3428_v33 }
  0x91   :  { %2606 = vmatpush1.msk.msra.mxu0 %vm1781_vm5, %v3441_v52  ;;  %2283 = vmatprep.mubr.f32.mxu0 %v4083_v27 }
  0x92   :  { %1632 = vmatmul.mubr.f32.vlgmr.msra.gmra.mrb[8].mxu1 %v3001_v11 }
  0x93   :  { %2786 = vmatpush1.bf16.msk.msra.mxu1 %vm3575_vm6, %v4093_v42  ;;  %1637 = vmatprep.mubr.f32.mxu1 %v4083_v27 }
  0x94   :  { %2788 = vmatprep.subr.msk.bf16.mxu1 %vm3591_vm15, %v4093_v42  ;;  %2285 = vmatmul.mubr.f32.gmra.mrb[10].mxu0 %v3625_v61 }
  0x95   :  { %2290 = vmatprep.mubr.f32.mxu0 %v4083_v27 }
  0x96   :  { %1639 = vmatmul.mubr.f32.gmra.mrb[10].mxu1 %v3003_v12 }
  0x97   :  { %2790 = vmatpush1.bf16.msk.msra.mxu1 %vm3637_vm4, %v4093_v42  ;;  %1644 = vmatprep.mubr.f32.mxu1 %v4083_v27 }
  0x98   :  { %2792 = vmatprep.subr.msk.bf16.mxu1 %vm3658_vm12, %v4093_v42  ;;  %2292 = vmatmul.mubr.f32.gmra.mrb[12].mxu0 %v3667_v63 }
  0x99   :  { %2297 = vmatprep.mubr.f32.mxu0 %v4083_v27 }
  0x9a   :  { %1646 = vmatmul.mubr.f32.gmra.mrb[12].mxu1 %v3005_v13 }
  0x9b   :  { %2794 = vmatpush1.bf16.msk.msra.mxu1 %vm3698_vm8, %v4093_v42  ;;  %1651 = vmatprep.mubr.f32.mxu1 %v4083_v27 }
  0x9c   :  { %2796 = vmatprep.subr.msk.bf16.mxu1 %vm3716_vm10, %v4093_v42  ;;  %2299 = vmatmul.mubr.f32.gmra.mrb[14].mxu0 %v3760_v18 }
  0x9d   :  { %2371 = vmatprep.mubr.f32.mxu0 %v4083_v27 }
  0x9e   :  { %1653 = vmatmul.mubr.f32.gmra.mrb[14].mxu1 %v3052_v29 }
  0x9f   :  { %2798 = vmatpush1.bf16.msk.msra.mxu1 %vm3751_vm14, %v4093_v42  ;;  %1739 = vmatprep.mubr.f32.mxu1 %v4083_v27 }
  0xa0   :  { %2373 = vmatmul.mubr.f32.vlgmr.msra.gmra.mrb[8].mxu0 %v3428_v33 }
  0xa1   :  { %2378 = vmatprep.mubr.f32.mxu0 %v4083_v27 }
  0xa2   :  { %1741 = vmatmul.mubr.f32.vlgmr.msra.gmra.mrb[8].mxu1 %v3001_v11 }
  0xa3   :  { %1746 = vmatprep.mubr.f32.mxu1 %v4083_v27 }
  0xa4   :  { %2380 = vmatmul.mubr.f32.gmra.mrb[10].mxu0 %v3625_v61 }
  0xa5   :  { %2385 = vmatprep.mubr.f32.mxu0 %v4083_v27 }
  0xa6   :  { %1748 = vmatmul.mubr.f32.gmra.mrb[10].mxu1 %v3003_v12 }
  0xa7   :  { %1753 = vmatprep.mubr.f32.mxu1 %v4083_v27 }
  0xa8   :  { %2387 = vmatmul.mubr.f32.gmra.mrb[12].mxu0 %v3667_v63 }
  0xa9   :  { %2392 = vmatprep.mubr.f32.mxu0 %v4083_v27 }
  0xaa   :  { %1755 = vmatmul.mubr.f32.gmra.mrb[12].mxu1 %v3005_v13 }
  0xab   :  { %1760 = vmatprep.mubr.f32.mxu1 %v4083_v27 }
  0xac   :  { %2394 = vmatmul.mubr.f32.gmra.mrb[14].mxu0 %v3760_v18 }
  0xae   :  { %1762 = vmatmul.mubr.f32.gmra.mrb[14].mxu1 %v3052_v29 }
 0x113   :  { %v948_v11 = vpop.f32.mrb[0].mxu0 }
 0x114   :  { %v950_v42 = vpop.f32.mrb[1].mxu0 }
 0x115   :  { %v578_v33 = vpop.f32.mrb[0].mxu1 }
 0x116   :  { %v2799_v52 = vadd.f32 %v948_v11, %v578_v33  ;;  %v580_v61 = vpop.f32.mrb[1].mxu1  ;;  %v2949_v33 = vmov 1966171168  }
 0x117   :  { %v2800_v12 = vadd.f32 %v950_v42, %v580_v61  ;;  %v955_v15 = vpop.f32.mrb[2].mxu0 }
 0x118   :  { %v957_v56 = vpop.f32.mrb[3].mxu0 }
 0x119   :  { %v586_v47 = vpop.f32.mrb[2].mxu1 }
 0x11a   :  { %v2801_v14 = vadd.f32 %v955_v15, %v586_v47  ;;  %v588_v57 = vpop.f32.mrb[3].mxu1 }
 0x11b   :  { %v2802_v60 = vadd.f32 %v957_v56, %v588_v57  ;;  %v962_v63 = vpop.f32.mrb[4].mxu0 }
 0x11c   :  { %v964_v13 = vpop.f32.mrb[5].mxu0 }
 0x11d   :  { %v594_v31 = vpop.f32.mrb[4].mxu1 }
 0x11e   :  { %v2803_v27 = vadd.f32 %v962_v63, %v594_v31  ;;  %v596_v50 = vpop.f32.mrb[5].mxu1 }
 0x11f   :  { %v2804_v18 = vadd.f32 %v964_v13, %v596_v50  ;;  %v969_v19 = vpop.f32.mrb[6].mxu0  ;;  %v4167_v13 = vld [vmem:[#allocation5_spill] sm:$0xff] }
 0x120   :  { %v971_v29 = vpop.f32.mrb[7].mxu0 }
 0x121   :  { %v602_v9 = vpop.f32.mrb[6].mxu1 }
 0x122   :  { %v2805_v28 = vadd.f32 %v969_v19, %v602_v9  ;;  %v604_v35 = vpop.f32.mrb[7].mxu1 }
 0x123   :  { %v2806_v55 = vadd.f32 %v971_v29, %v604_v35 }
 0x173   :  { %v2374_v7 = vpop.f32.mrb[8].mxu0 }
 0x174   :  { %v2400_v40 = vmul.f32 %v2799_v52, %v2374_v7  ;;  %v2376_v44 = vpop.f32.mrb[9].mxu0  ;;  %v2438_v52 = vunpack.c.l.s4 %v2949_v33 }
 0x175   :  { %v1742_v58 = vpop.f32.mrb[8].mxu1  ;;  %v2401_v34 = vmul.f32 %v2800_v12, %v2376_v44 }
 0x176   :  { %v2408_v49 = vmul.f32 %v2400_v40, %v1742_v58  ;;  %v1744_v38 = vpop.f32.mrb[9].mxu1  ;;  %v2439_v47 = vunpack.c.0.s8 %v2438_v52 }
 0x177   :  { %v2409_v3 = vmul.f32 %v2401_v34, %v1744_v38  ;;  %v2381_v20 = vpop.f32.mrb[10].mxu0 }
 0x178   :  { %v2402_v1 = vmul.f32 %v2801_v14, %v2381_v20  ;;  %v2383_v24 = vpop.f32.mrb[11].mxu0  ;;  %v2442_v31 = vsub.s32 %v2439_v47, %v4167_v13 }
 0x179   :  { %v1749_v62 = vpop.f32.mrb[10].mxu1  ;;  %v2403_v51 = vmul.f32 %v2802_v60, %v2383_v24 }
 0x17a   :  { %v2410_v46 = vmul.f32 %v2402_v1, %v1749_v62  ;;  %v1751_v17 = vpop.f32.mrb[11].mxu1 }
 0x17b   :  { %v2411_v8 = vmul.f32 %v2403_v51, %v1751_v17  ;;  %v2388_v59 = vpop.f32.mrb[12].mxu0 }
 0x17c   :  { %v2416_v2 = vadd.f32 %v2410_v46, %v2408_v49  ;;  %v2404_v25 = vmul.f32 %v2803_v27, %v2388_v59  ;;  %v2390_v22 = vpop.f32.mrb[13].mxu0 }
 0x17d   :  { %v2425_v10 = vadd.f32 %v2411_v8, %v2409_v3  ;;  %v1756_v53 = vpop.f32.mrb[12].mxu1  ;;  %v2405_v4 = vmul.f32 %v2804_v18, %v2390_v22  ;;  %v4168_v18 = vlaneseq }
 0x17e   :  { %v2412_v45 = vmul.f32 %v2404_v25, %v1756_v53  ;;  %v1758_v6 = vpop.f32.mrb[13].mxu1 }
 0x17f   :  { %v2413_v41 = vmul.f32 %v2405_v4, %v1758_v6  ;;  %v2395_v21 = vpop.f32.mrb[14].mxu0  ;;  %vm2454_vm13 = vcmp.lt.s32.totalorder %v4168_v18, 256 }
 0x180   :  { %v2417_v48 = vadd.f32 %v2416_v2, %v2412_v45  ;;  %v2406_v23 = vmul.f32 %v2805_v28, %v2395_v21  ;;  %v2397_v0 = vpop.f32.mrb[15].mxu0 }
 0x181   :  { %v2426_v5 = vadd.f32 %v2425_v10, %v2413_v41  ;;  %v1763_v43 = vpop.f32.mrb[14].mxu1  ;;  %v2407_v30 = vmul.f32 %v2806_v55, %v2397_v0 }
 0x182   :  { %v2414_v36 = vmul.f32 %v2406_v23, %v1763_v43  ;;  %v1765_v39 = vpop.f32.mrb[15].mxu1 }
 0x183   :  { %v2415_v16 = vmul.f32 %v2407_v30, %v1765_v39 }
 0x184   :  { %v2418_v26 = vadd.f32 %v2417_v48, %v2414_v36 }
 0x185   :  { %v2427_v32 = vadd.f32 %v2426_v5, %v2415_v16 }
 0x186   :  { %v2419_v54 = vrot.slane %v2418_v26, 4 }
 0x187   :  { %v2428_v37 = vrot.slane %v2427_v32, 4 }
 0x188   :  { %v2420_v11 = vadd.f32 %v2419_v54, %v2418_v26 }
 0x189   :  { %v2429_v42 = vadd.f32 %v2428_v37, %v2427_v32 }
 0x18a   :  { %v2421_v61 = vrot.slane %v2420_v11, 2 }
 0x18b   :  { %v2430_v12 = vrot.slane %v2429_v42, 2 }
 0x18c   :  { %v2422_v15 = vadd.f32 %v2421_v61, %v2420_v11 }
 0x18d   :  { %v2431_v56 = vadd.f32 %v2430_v12, %v2429_v42 }
 0x18e   :  { %v2423_v14 = vrot.slane %v2422_v15, 1 }
 0x18f   :  { %v2432_v57 = vrot.slane %v2431_v56, 1 }
 0x190   :  { %v2424_v60 = vadd.f32 %v2423_v14, %v2422_v15 }
 0x191   :  { %v2433_v63 = vadd.f32 %v2432_v57, %v2431_v56 }
 0x193   :  { %v2436_v27 = vcombine.low %v2424_v60, %v2433_v63 }
 0x195   :  { %v2443_v50 = vrot.slane %v2436_v27, %v2442_v31 }
 0x197   :  { %v2450_v19 = vrot.slane %v2443_v50, %v2442_v31 }
 0x199   :  { %2456 = vst.msk [vmem:[#allocation2] sm:$0x3] %vm2454_vm13, %v2450_v19 }
 0x19a   :  { %2934 = shalt.err (!%p2931_p4)
}
 0x19b   :  { %s2935_s15 = scalar_lea.hbm %s4021_s5, 32 }
 0x19c   :  { %p2936_p5 = scmp.ne.s32.totalorder %s4021_s5, %s2935_s15  ;;  %p2939_p6 = scmp.lt.u32.totalorder %s2935_s15, %s4021_s5 }
 0x19e   :  { %p2941_p7 = pnand %p2939_p6, %p2936_p5 }
 0x1a0   :  { %2944 = shalt.err (!%p2941_p7)
}
 0x1a1   :  { %2466 = dma.vmem_to_hbm [thread:$0]  %s2464_s11, 32, %s4021_s5, [#allocation3]  }
 0x1a2   :  { %2945 = dma.done.wait [#allocation3], 32  }
 0x1a3   :  { %2946 = vsyncadd [#allocation3], 4294967264 }
 0x1a4   :  { %2470 = vsyncpa [#allocation3], 1 }

</bundles_post_ra>
